<compile_context>
chip_gen: v7x
topology: tpu7x:2x2x1
jax: 0.10.0
libtpu: 0.0.40
codegen_flags: <defaults>
</compile_context>

<pallas_src>
import jax
import jax.numpy as jnp
from jax import lax
from jax.experimental import pallas as pl
from jax.experimental.pallas import tpu as pltpu

# ---------------- model hyper-parameters (small, consistent with the module) ----
IN_DIM = 32            # in_dim         (384 in the original)
HIDDEN_DIM = 64        # hidden_dim     (2048 in the original)
OUTPUT_DIM = 32        # output_dim     (256 in the original)
NMB_PROTOTYPES = 128   # nmb_prototypes (1024 in the original)
BN_EPS = 1e-5
NORM_EPS = 1e-12       # F.normalize eps

OUT_PAD = 128          # lane-dense output width (multiple of 128, >= OUTPUT_DIM)
TILE_N = 8             # rows per grid step; production: sweep (<= ~512 on v7x @ hidden=2048,
                       # larger on v5e/v6e with their 128 MiB VMEM)

# MXU operand dtype.  float32 keeps this small demo numerically faithful to the
# PyTorch module; set to jnp.bfloat16 on v6e/v7x at production dims (element-wise
# math and the final gather matmul stay f32 regardless).
MATMUL_DTYPE = jnp.float32

_INV_SQRT2 = 0.7071067811865476


def _mcw_kernel(feat_ref, w1_ref, b1_ref, w2_ref, b2_ref, wpt_ref, wppad_ref, out_ref):
    feat = feat_ref[...].astype(jnp.float32)

    # biases read once per body (no re-broadcast per op)
    b1 = b1_ref[...]
    b2 = b2_ref[...]

    # projection[0] Linear(in_dim, hidden_dim) with BatchNorm1d(eval) pre-folded
    h = jnp.dot(feat.astype(MATMUL_DTYPE), w1_ref[...].astype(MATMUL_DTYPE),
                preferred_element_type=jnp.float32) + b1

    # projection[2]: GELU (exact erf form, nn.GELU default)
    h = 0.5 * h * (1.0 + lax.erf(h * jnp.float32(_INV_SQRT2)))

    # projection[3]: Linear(hidden_dim, output_dim)
    z = jnp.dot(h.astype(MATMUL_DTYPE), w2_ref[...].astype(MATMUL_DTYPE),
                preferred_element_type=jnp.float32) + b2

    # F.normalize(x, dim=1, p=2): x / max(||x||, eps) == x * rsqrt(max(sumsq, eps^2))
    sumsq = jnp.sum(z * z, axis=1, keepdims=True)
    z = z * lax.rsqrt(jnp.maximum(sumsq, jnp.float32(NORM_EPS * NORM_EPS)))

    # prototypes: bias-free Linear -> logits [tile_n, P]
    # weight pre-transposed in the wrapper: clean [N,K]@[K,P] MXU matmul.
    logits = jnp.dot(z.astype(MATMUL_DTYPE), wpt_ref[...].astype(MATMUL_DTYPE),
                     preferred_element_type=jnp.float32)

    # _, pro_ind = x.max(1);  x = prototypes.weight[pro_ind]
    n, p = logits.shape
    iota = lax.broadcasted_iota(jnp.int32, (n, p), 1)
    maxv = jnp.max(logits, axis=1, keepdims=True)
    # first index attaining the max (matches torch argmax tie-break)
    idx = jnp.min(jnp.where(logits == maxv, iota, jnp.int32(p)), axis=1, keepdims=True)
    onehot = (iota == idx).astype(jnp.float32)
    # row gather via MXU against the zero-padded (lane-dense, 128-wide) prototype
    # table; kept in f32 so the returned prototype rows are exact.
    out_ref[...] = jnp.dot(onehot, wppad_ref[...],
                           preferred_element_type=jnp.float32).astype(out_ref.dtype)


def multicrop_wrapper_forward(x_nchw, params, tile_n=TILE_N):
    """x_nchw: [N, C, H, W] with C == IN_DIM. Returns [N, OUTPUT_DIM]."""
    # --- backbone glue (plain JAX): global average pool -> [N, in_dim] ---
    # TODO(synk): real backbone is an external injected module; modeled as GAP.
    feat = jnp.mean(x_nchw, axis=(2, 3)).astype(jnp.float32)
    n = feat.shape[0]

    # pad batch to a multiple of tile_n; padded rows are discarded after the call
    n_pad = pl.cdiv(n, tile_n) * tile_n
    if n_pad != n:
        feat = jnp.pad(feat, ((0, n_pad - n), (0, 0)))

    # fold eval-mode BatchNorm1d into the first Linear (static affine)
    scale = params["bn_gamma"] * lax.rsqrt(params["bn_var"] + BN_EPS)   # [1, HID]
    w1f = params["w1"] * scale                                          # [IN, HID]
    b1f = (params["b1"] - params["bn_mean"]) * scale + params["bn_beta"]

    wp = params["wp"]                                   # [P, OUTPUT_DIM] (torch layout)
    wp_t = wp.T                                         # [OUTPUT_DIM, P] for logits matmul
    wp_pad = jnp.pad(wp, ((0, 0), (0, OUT_PAD - OUTPUT_DIM)))  # [P, 128] lane-dense gather

    grid = (n_pad // tile_n,)
    out = pl.pallas_call(
        _mcw_kernel,
        out_shape=jax.ShapeDtypeStruct((n_pad, OUT_PAD), jnp.float32),
        grid=grid,
        in_specs=[
            pl.BlockSpec((tile_n, IN_DIM), lambda i: (i, 0)),              # feat (streamed)
            pl.BlockSpec((IN_DIM, HIDDEN_DIM), lambda i: (0, 0)),          # w1 (folded, resident)
            pl.BlockSpec((1, HIDDEN_DIM), lambda i: (0, 0)),               # b1 (folded)
            pl.BlockSpec((HIDDEN_DIM, OUTPUT_DIM), lambda i: (0, 0)),      # w2
            pl.BlockSpec((1, OUTPUT_DIM), lambda i: (0, 0)),               # b2
            pl.BlockSpec((OUTPUT_DIM, NMB_PROTOTYPES), lambda i: (0, 0)),  # wp^T
            pl.BlockSpec((NMB_PROTOTYPES, OUT_PAD), lambda i: (0, 0)),     # wp zero-padded
        ],
        out_specs=pl.BlockSpec((tile_n, OUT_PAD), lambda i: (i, 0)),
        compiler_params=pltpu.CompilerParams(
            dimension_semantics=("parallel",)),
    )(feat, w1f, b1f, params["w2"], params["b2"], wp_t, wp_pad)
    return out[:n, :OUTPUT_DIM]


def make_params(key):
    ks = jax.random.split(key, 4)
    # linear weights stored already transposed for row-major [K, M] matmul
    # (PyTorch keeps [M, K])
    w1 = jax.random.normal(ks[0], (IN_DIM, HIDDEN_DIM), jnp.float32) * (IN_DIM ** -0.5)
    b1 = jnp.zeros((1, HIDDEN_DIM), jnp.float32)
    w2 = jax.random.normal(ks[1], (HIDDEN_DIM, OUTPUT_DIM), jnp.float32) * (HIDDEN_DIM ** -0.5)
    b2 = jnp.zeros((1, OUTPUT_DIM), jnp.float32)
    return dict(
        w1=w1, b1=b1, w2=w2, b2=b2,
        # BatchNorm1d (eval mode): gamma=1, beta=0, running_mean=0, running_var=1
        bn_gamma=jnp.ones((1, HIDDEN_DIM), jnp.float32),
        bn_beta=jnp.zeros((1, HIDDEN_DIM), jnp.float32),
        bn_mean=jnp.zeros((1, HIDDEN_DIM), jnp.float32),
        bn_var=jnp.ones((1, HIDDEN_DIM), jnp.float32),
        # prototypes.weight: [nmb_prototypes, output_dim] (PyTorch layout,
        # since the forward also indexes its rows)
        wp=jax.random.normal(ks[2], (NMB_PROTOTYPES, OUTPUT_DIM), jnp.float32)
           * (OUTPUT_DIM ** -0.5),
    )


def reference_forward(x_nchw, p):
    feat = jnp.mean(x_nchw, axis=(2, 3)).astype(jnp.float32)
    h = feat @ p["w1"] + p["b1"]
    h = (h - p["bn_mean"]) * lax.rsqrt(p["bn_var"] + BN_EPS) * p["bn_gamma"] + p["bn_beta"]
    h = 0.5 * h * (1.0 + lax.erf(h / jnp.sqrt(2.0)))
    z = h @ p["w2"] + p["b2"]
    z = z / jnp.maximum(jnp.linalg.norm(z, axis=1, keepdims=True), NORM_EPS)
    logits = z @ p["wp"].T
    idx = jnp.argmax(logits, axis=1)
    return p["wp"][idx]


if __name__ == "__main__":
    key = jax.random.PRNGKey(0)
    kx, kp = jax.random.split(key)
    # input images, NCHW, channels == in_dim for the GAP backbone stand-in;
    # batch=12 is deliberately NOT a multiple of TILE_N to exercise padding.
    x = jax.random.normal(kx, (12, IN_DIM, 8, 8), jnp.float32)
    params = make_params(kp)

    out = multicrop_wrapper_forward(x, params)
    out = jax.block_until_ready(out)

    ref = reference_forward(x, params)
    assert out.shape == (12, OUTPUT_DIM)
    assert jnp.allclose(out, ref, atol=1e-3, rtol=1e-3), "mismatch vs reference"
    print("KERNEL_OK")
</pallas_src>

<mosaic_0001>
module attributes {stable_mosaic.version = 11 : i64} {
  func.func @_mcw_kernel(%arg0: i32, %arg1: memref<8x32xf32, #tpu.memory_space<vmem>>, %arg2: memref<32x64xf32, #tpu.memory_space<vmem>>, %arg3: memref<1x64xf32, #tpu.memory_space<vmem>>, %arg4: memref<64x32xf32, #tpu.memory_space<vmem>>, %arg5: memref<1x32xf32, #tpu.memory_space<vmem>>, %arg6: memref<32x128xf32, #tpu.memory_space<vmem>>, %arg7: memref<128x128xf32, #tpu.memory_space<vmem>>, %arg8: memref<8x128xf32, #tpu.memory_space<vmem>>) attributes {dimension_semantics = [#tpu.dimension_semantics<parallel>], iteration_bounds = array<i64: 2>, scalar_prefetch = 0 : i64, scratch_operands = 0 : i64, tpu.core_type = #tpu.core_type<tc>, window_params = [{transform_indices = @transform_0, window_bounds = array<i64: 8, 32>}, {pipeline_mode = #tpu.pipeline_mode<synchronous>, transform_indices = @transform_1, window_bounds = array<i64: 32, 64>}, {pipeline_mode = #tpu.pipeline_mode<synchronous>, transform_indices = @transform_2, window_bounds = array<i64: 1, 64>}, {pipeline_mode = #tpu.pipeline_mode<synchronous>, transform_indices = @transform_3, window_bounds = array<i64: 64, 32>}, {pipeline_mode = #tpu.pipeline_mode<synchronous>, transform_indices = @transform_4, window_bounds = array<i64: 1, 32>}, {pipeline_mode = #tpu.pipeline_mode<synchronous>, transform_indices = @transform_5, window_bounds = array<i64: 32, 128>}, {pipeline_mode = #tpu.pipeline_mode<synchronous>, transform_indices = @transform_6, window_bounds = array<i64: 128, 128>}, {transform_indices = @transform_7, window_bounds = array<i64: 8, 128>}]} {
    %c0 = arith.constant 0 : index
    %c0_0 = arith.constant 0 : index
    %0 = vector.load %arg1[%c0, %c0_0] : memref<8x32xf32, #tpu.memory_space<vmem>>, vector<8x32xf32>
    %c0_1 = arith.constant 0 : index
    %c0_2 = arith.constant 0 : index
    %1 = vector.load %arg3[%c0_1, %c0_2] : memref<1x64xf32, #tpu.memory_space<vmem>>, vector<1x64xf32>
    %c0_3 = arith.constant 0 : index
    %c0_4 = arith.constant 0 : index
    %2 = vector.load %arg5[%c0_3, %c0_4] : memref<1x32xf32, #tpu.memory_space<vmem>>, vector<1x32xf32>
    %c0_5 = arith.constant 0 : index
    %c0_6 = arith.constant 0 : index
    %3 = vector.load %arg2[%c0_5, %c0_6] : memref<32x64xf32, #tpu.memory_space<vmem>>, vector<32x64xf32>
    %cst = arith.constant dense<0.000000e+00> : vector<8x64xf32>
    %4 = tpu.matmul %0, %3, %cst {dimension_numbers = #tpu.dot_dimension_numbers<[1], [0], [0], [1], [0, 0, 1, 1], [], []>} : vector<8x32xf32>, vector<32x64xf32>, vector<8x64xf32> -> vector<8x64xf32>
    %5 = vector.broadcast %1 : vector<1x64xf32> to vector<8x64xf32>
    %6 = arith.addf %4, %5 : vector<8x64xf32>
    %cst_7 = arith.constant 5.000000e-01 : f32
    %7 = vector.broadcast %cst_7 : f32 to vector<8x64xf32>
    %8 = arith.mulf %7, %6 : vector<8x64xf32>
    %cst_8 = arith.constant 0.707106769 : f32
    %9 = vector.broadcast %cst_8 : f32 to vector<8x64xf32>
    %10 = arith.mulf %6, %9 : vector<8x64xf32>
    %11 = math.erf %10 : vector<8x64xf32>
    %cst_9 = arith.constant 1.000000e+00 : f32
    %12 = vector.broadcast %cst_9 : f32 to vector<8x64xf32>
    %13 = arith.addf %12, %11 : vector<8x64xf32>
    %14 = arith.mulf %8, %13 : vector<8x64xf32>
    %c0_10 = arith.constant 0 : index
    %c0_11 = arith.constant 0 : index
    %15 = vector.load %arg4[%c0_10, %c0_11] : memref<64x32xf32, #tpu.memory_space<vmem>>, vector<64x32xf32>
    %cst_12 = arith.constant dense<0.000000e+00> : vector<8x32xf32>
    %16 = tpu.matmul %14, %15, %cst_12 {dimension_numbers = #tpu.dot_dimension_numbers<[1], [0], [0], [1], [0, 0, 1, 1], [], []>} : vector<8x64xf32>, vector<64x32xf32>, vector<8x32xf32> -> vector<8x32xf32>
    %17 = vector.broadcast %2 : vector<1x32xf32> to vector<8x32xf32>
    %18 = arith.addf %16, %17 : vector<8x32xf32>
    %19 = arith.mulf %18, %18 : vector<8x32xf32>
    %cst_13 = arith.constant dense<0.000000e+00> : vector<8xf32>
    %20 = vector.multi_reduction <add>, %19, %cst_13 [1] : vector<8x32xf32> to vector<8xf32>
    %21 = vector.shape_cast %20 : vector<8xf32> to vector<8x1xf32>
    %cst_14 = arith.constant 1.000000e-24 : f32
    %22 = vector.broadcast %cst_14 : f32 to vector<8x1xf32>
    %23 = arith.maximumf %21, %22 : vector<8x1xf32>
    %24 = math.rsqrt %23 : vector<8x1xf32>
    %25 = vector.broadcast %24 : vector<8x1xf32> to vector<8x32xf32>
    %26 = arith.mulf %18, %25 : vector<8x32xf32>
    %c0_15 = arith.constant 0 : index
    %c0_16 = arith.constant 0 : index
    %27 = vector.load %arg6[%c0_15, %c0_16] : memref<32x128xf32, #tpu.memory_space<vmem>>, vector<32x128xf32>
    %cst_17 = arith.constant dense<0.000000e+00> : vector<8x128xf32>
    %28 = tpu.matmul %26, %27, %cst_17 {dimension_numbers = #tpu.dot_dimension_numbers<[1], [0], [0], [1], [0, 0, 1, 1], [], []>} : vector<8x32xf32>, vector<32x128xf32>, vector<8x128xf32> -> vector<8x128xf32>
    %29 = tpu.iota {dimensions = array<i32: 1>} : vector<8x128xi32>
    %cst_18 = arith.constant dense<0xFF800000> : vector<8xf32>
    %30 = vector.multi_reduction <maximumf>, %28, %cst_18 [1] : vector<8x128xf32> to vector<8xf32>
    %31 = vector.shape_cast %30 : vector<8xf32> to vector<8x1xf32>
    %32 = vector.broadcast %31 : vector<8x1xf32> to vector<8x128xf32>
    %33 = arith.cmpf oeq, %28, %32 : vector<8x128xf32>
    %c128_i32 = arith.constant 128 : i32
    %34 = vector.broadcast %c128_i32 : i32 to vector<8x128xi32>
    %35 = arith.select %33, %29, %34 : vector<8x128xi1>, vector<8x128xi32>
    %cst_19 = arith.constant dense<2147483647> : vector<8xi32>
    %36 = vector.multi_reduction <minsi>, %35, %cst_19 [1] : vector<8x128xi32> to vector<8xi32>
    %37 = vector.shape_cast %36 : vector<8xi32> to vector<8x1xi32>
    %38 = vector.broadcast %37 : vector<8x1xi32> to vector<8x128xi32>
    %39 = arith.cmpi eq, %29, %38 : vector<8x128xi32>
    %40 = arith.extui %39 : vector<8x128xi1> to vector<8x128xi32>
    %41 = arith.sitofp %40 : vector<8x128xi32> to vector<8x128xf32>
    %c0_20 = arith.constant 0 : index
    %c0_21 = arith.constant 0 : index
    %42 = vector.load %arg7[%c0_20, %c0_21] : memref<128x128xf32, #tpu.memory_space<vmem>>, vector<128x128xf32>
    %cst_22 = arith.constant dense<0.000000e+00> : vector<8x128xf32>
    %43 = tpu.matmul %41, %42, %cst_22 {dimension_numbers = #tpu.dot_dimension_numbers<[1], [0], [0], [1], [0, 0, 1, 1], [], []>} : vector<8x128xf32>, vector<128x128xf32>, vector<8x128xf32> -> vector<8x128xf32>
    %c0_23 = arith.constant 0 : index
    %c0_24 = arith.constant 0 : index
    %44 = vector.load %arg8[%c0_23, %c0_24] : memref<8x128xf32, #tpu.memory_space<vmem>>, vector<8x128xf32>
    tpu.vector_store %arg8[%c0_23, %c0_24], %43 {strides = array<i32>} : memref<8x128xf32, #tpu.memory_space<vmem>>, vector<8x128xf32>,
    return
  }
  func.func @transform_0(%arg0: i32) -> (i32, i32) {
    %c0_i32 = arith.constant 0 : i32
    %c0_i32_0 = arith.constant 0 : i32
    return %arg0, %c0_i32 : i32, i32
  }
  func.func @transform_1(%arg0: i32) -> (i32, i32) {
    %c0_i32 = arith.constant 0 : i32
    %c0_i32_0 = arith.constant 0 : i32
    %c0_i32_1 = arith.constant 0 : i32
    return %c0_i32, %c0_i32_0 : i32, i32
  }
  func.func @transform_2(%arg0: i32) -> (i32, i32) {
    %c0_i32 = arith.constant 0 : i32
    %c0_i32_0 = arith.constant 0 : i32
    %c0_i32_1 = arith.constant 0 : i32
    return %c0_i32, %c0_i32_0 : i32, i32
  }
  func.func @transform_3(%arg0: i32) -> (i32, i32) {
    %c0_i32 = arith.constant 0 : i32
    %c0_i32_0 = arith.constant 0 : i32
    %c0_i32_1 = arith.constant 0 : i32
    return %c0_i32, %c0_i32_0 : i32, i32
  }
  func.func @transform_4(%arg0: i32) -> (i32, i32) {
    %c0_i32 = arith.constant 0 : i32
    %c0_i32_0 = arith.constant 0 : i32
    %c0_i32_1 = arith.constant 0 : i32
    return %c0_i32, %c0_i32_0 : i32, i32
  }
  func.func @transform_5(%arg0: i32) -> (i32, i32) {
    %c0_i32 = arith.constant 0 : i32
    %c0_i32_0 = arith.constant 0 : i32
    %c0_i32_1 = arith.constant 0 : i32
    return %c0_i32, %c0_i32_0 : i32, i32
  }
  func.func @transform_6(%arg0: i32) -> (i32, i32) {
    %c0_i32 = arith.constant 0 : i32
    %c0_i32_0 = arith.constant 0 : i32
    %c0_i32_1 = arith.constant 0 : i32
    return %c0_i32, %c0_i32_0 : i32, i32
  }
  func.func @transform_7(%arg0: i32) -> (i32, i32) {
    %c0_i32 = arith.constant 0 : i32
    %c0_i32_0 = arith.constant 0 : i32
    return %arg0, %c0_i32 : i32, i32
  }
}

</mosaic_0001>

<bundles_post_ra>
// kernel: tpu_custom_call.1
= control target key start
LH: loop header
LB: loop body
LE: loop exit
PB: predicated region body
PF: predicated region fallthrough
CT: control target
= control target key end

     0   :  { %12 = vsyncpa [#allocation3], 0  ;;  %s1343_s0 = inlined_call_operand.vmem [shape: f32[16,32], index: 0, kind: input, shape index: {}]   ;;  %s1344_s1 = inlined_call_operand.vmem [shape: f32[32,64], index: 1, kind: input, shape index: {}]   ;;  %s1345_s2 = inlined_call_operand.vmem [shape: f32[1,64], index: 2, kind: input, shape index: {}]   ;;  %s1346_s3 = inlined_call_operand.vmem [shape: f32[64,32], index: 3, kind: input, shape index: {}]   ;;  %s1347_s4 = inlined_call_operand.vmem [shape: f32[1,32], index: 4, kind: input, shape index: {}]   ;;  %s1348_s5 = inlined_call_operand.vmem [shape: f32[32,128], index: 5, kind: input, shape index: {}]   ;;  %s1349_s6 = inlined_call_operand.hbm [shape: f32[128,128], index: 6, kind: input, shape index: {}]   ;;  %s1350_s7 = inlined_call_operand.hbm [shape: f32[16,128], index: 7, kind: output, shape index: {}]  }
   0x1   :  { %13 = vsyncpa [#allocation4], 0 }
   0x2   :  { %15 = vsyncpa [#allocation4 + $0x1], 0  ;;  %s1131_s24 = smov 0   ;;  %s1133_s25 = smov 0  }
   0x3   :  { %s1135_s26 = smov 0   ;;  %s1137_s27 = smov 0  }
   0x4 LB: > { %s1152_s28 = sadd.s32 4294967295, %s1081_s27   ;;  %s748_s29 = sadd.s32 4294967294, %s1081_s27   ;;  %s1081_s27 = sphi %s1137_s27, %s1366_s27   ;;  %s1077_s26 = sphi %s1135_s26, %s1365_s26   ;;  %s1073_s25 = sphi %s1133_s25, %s1364_s25   ;;  %s1069_s24 = sphi %s1131_s24, %s1363_s24  }
   0x5   : > { %s1156_s30 = sadd.s32 1, %s1081_s27   ;;  %s180_s8 = sadd.s32 1, %s1077_s26 }
   0x6   : > { %s177_s9 = ssub.s32 %s1081_s27, %s1156_s30  ;;  %p190_p0 = scmp.ne.s32.totalorder %s1077_s26, %s1073_s25 }
   0x7   : > { %p178_p1 = scmp.eq.s32.totalorder %s177_s9, 0  ;;  %p191_p2 = scmp.eq.s32.totalorder %s1152_s28, 1 }
   0x8   : > { %p196_p3 = scmp.ne.s32.totalorder %s1073_s25, %s1069_s24  ;;  %p197_p4 = scmp.eq.s32.totalorder %s748_s29, 1 }
   0x9   : > { %s1167_s10 = scalar_select %p178_p1, %s1077_s26, %s180_s8  }
   0xa   : > { %p1169_p5 = por %p191_p2, %p190_p0  ;;  %p1173_p6 = por %p197_p4, %p196_p3 }
   0xb   : > { %p749_p7 = scmp.ge.s32.totalorder %s1081_s27, 1  ;;  %p204_p8 = scmp.lt.s32.totalorder %s1081_s27, 3 }
   0xc   : > { %s1354_s11 = scalar_select %p1169_p5, 1, 0 }
   0xd   : > { %s1355_s12 = scalar_select %p1173_p6, 1, 0 }
   0xe   : > { %p1351_p9 = scmp.eq.s32.totalorder %s1152_s28, 0  ;;  %p1180_p10 = pnand %p749_p7, %p204_p8 }
   0xf   : > { %s1083_s14 = smov [#allocation2]   ;;  %s987_s19 = scalar_lea.hbm %s1349_s6, 2048 }
  0x10   : > { %s1356_s13 = scalar_select %p1180_p10, 1, 0 }
  0x11   : > { %s231_s15 = sshll.u32 %s1083_s14, 4  ;;  %p933_p11 = pneg %p1180_p10  ;;  %s232_s15 = int_to_ptr.vmem [resolvable:$true] %s231_s15 }
  0x12   : > { %p988_p13 = scmp.ne.s32.totalorder %s1349_s6, %s987_s19  ;;  %p994_p3 = scmp.lt.u32.totalorder %s987_s19, %s1349_s6 }
  0x13   : > { %p1188_p12 = pnand %p1351_p9, %p933_p11 }
  0x15   : > { %p989_p0 = pneg %p1188_p12 }
  0x17   : > { %p990_p1 = pnand %p989_p0, %p988_p13 }
  0x19   : > { %p991_p2 = pneg %p990_p1 }
  0x1b   : > { %p996_p4 = pnand %p994_p3, %p991_p2 }
  0x1d   : > { %999 = shalt.err (!%p996_p4)
}
  0x1e   : > { %s1000_s29 = scalar_lea.vmem %s232_s15, 2048  ;;  %p1008_p9 = scmp.lt.s32.totalorder %s232_s15, %s232_s15 }
  0x1f   : > { %p1001_p7 = scmp.ne.s32.totalorder %s232_s15, %s1000_s29  ;;  %p1009_p6 = scmp.lt.s32.totalorder %s1000_s29, %s1000_s29 }
  0x21   : > { %p1003_p8 = pnand %p1001_p7, %p989_p0  ;;  %p1010_p5 = por %p1009_p6, %p1008_p9 }
  0x23   : > { %p1004_p11 = pneg %p1003_p8 }
  0x25   : > { %p1011_p10 = pnand %p1010_p5, %p1004_p11 }
  0x27   : > { %1014 = shalt.err (!%p1011_p10)
}
  0x28   : > { %s1084_s8 = smov 128   ;;  %s1085_s9 = smov 8  }
  0x29   : > { %936 = dma.hbm_to_vmem [thread:$0]  (!%p1188_p12), %s1349_s6, 2048, %s232_s15, [#allocation3], %s1084_s8, %s1084_s8, %s1085_s9  }
  0x2a   : > { %p1358_p13 = scmp.ne.s32.totalorder %s1356_s13, 0 }
  0x2b   : > { %p1359_p1 = scmp.eq.s32.totalorder (!%p1358_p13), %s1152_s28, 0 }
  0x2c   : > { %254 = sbr.rel (%p1358_p13) target bundleno = 1544 (0x608), region = 48 }
  0x33   : > { %1060 = dma.done.wait (%p1359_p1), [#allocation3], 2048   ;;  %p1360_p0 = pmov %p1359_p1 }
  0x34   : > { %p285_p5 = scmp.lt.s32.totalorder %s1152_s28, 1  ;;  %v1086_v0 = vmov 0.0|0.0   ;;  %vm1087_vm0 = vmmov 0   ;;  %v1088_v1 = vmov 0.0   ;;  %v292_v2 = vld [vmem:[%s1344_s1] sm:$0xff]  ;;  %v293_v3 = vld [vmem:[%s1344_s1 + $0x8] sm:$0xff]  ;;  %v553_v48 = vlaneseq }
  0x35   : > { %1062 = vsyncadd (%p1360_p0), [#allocation3], 4294965248  ;;  %879 = vmatprep.subr.bf16.mxu1 %v1086_v0  ;;  %811 = vmatprep.mubr.msk.f32.mxu1 %vm1087_vm0, %v1088_v1  ;;  %v294_v4 = vld [vmem:[%s1344_s1 + $0x10] sm:$0xff]  ;;  %v880_v5 = vpack.c.bf16 %v293_v3, %v292_v2  ;;  %v295_v6 = vld [vmem:[%s1344_s1 + $0x18] sm:$0xff]  ;;  %vm302_vm1 = vcmask 261120   ;;  %vm395_vm2 = vcmask 523264  }
  0x36   : > { %903 = vmatprep.subr.bf16.mxu0 %v1086_v0  ;;  %876 = vmatprep.mubr.msk.f32.mxu0 %vm1087_vm0, %v1088_v1  ;;  %s286_s13 = scalar_select %p285_p5, %s1152_s28, 1  ;;  %v883_v7 = vpack.c.bf16 %v295_v6, %v294_v4  ;;  %v381_v9 = vld [vmem:[%s1346_s3] sm:$0xff]  ;;  %v382_v10 = vld [vmem:[%s1346_s3 + $0x8] sm:$0xff]  ;;  %v383_v12 = vld [vmem:[%s1346_s3 + $0x10] sm:$0xff]  ;;  %v554_v49 = vand.u32 127, %v553_v48 }
  0x37   : > { %881 = vmatpush3.bf16.msra.mxu1 %v880_v5  ;;  %v886_v11 = vpack.c.bf16 %v382_v10, %v381_v9  ;;  %v384_v13 = vld [vmem:[%s1346_s3 + $0x18] sm:$0xff]  ;;  %v385_v15 = vld [vmem:[%s1346_s3 + $0x20] sm:$0xff]  ;;  %v386_v16 = vld [vmem:[%s1346_s3 + $0x28] sm:$0xff]  ;;  %s282_s17 = sand.u32 1, %s1073_s25   ;;  %s764_s18 = sshll.u32 %s1152_s28, 7 }
  0x38   : > { %s755_s29 = sshll.u32 %s286_s13, 3  ;;  %882 = vmatprep.subr.bf16.mxu1 %v1086_v0  ;;  %v889_v14 = vpack.c.bf16 %v384_v13, %v383_v12  ;;  %v892_v17 = vpack.c.bf16 %v386_v16, %v385_v15  ;;  %v387_v18 = vld [vmem:[%s1346_s3 + $0x30] sm:$0xff]  ;;  %v388_v19 = vld [vmem:[%s1346_s3 + $0x38] sm:$0xff]  ;;  %v756_v21 = vld [vmem:[%s1345_s2] ss:$0 sm:$0xff]  ;;  %s754_s15 = sshll.u32 %s282_s17, 3 }
  0x39   : > { %s288_s14 = scalar_lea.vmem %s1343_s0, %s755_s29  ;;  %v895_v20 = vpack.c.bf16 %v388_v19, %v387_v18  ;;  %v758_v30 = vld [vmem:[%s1347_s4] ss:$0 sm:$0xff]  ;;  %v477_v37 = vld [vmem:[%s1348_s5 + $0x8] sm:$0xff]  ;;  %v478_v38 = vld [vmem:[%s1348_s5 + $0x10] sm:$0xff]  ;;  %s284_s13 = scalar_lea.vmem [#allocation5], %s754_s15 }
  0x3a   : > { %v289_v8 = vld [vmem:[%s288_s14] sm:$0xff]  ;;  %v479_v40 = vld [vmem:[%s1348_s5 + $0x18] sm:$0xff]  ;;  %v577_v55 = vld [vmem:[#allocation2 + $0x8] sm:$0xff]  ;;  %s677_s16 = sshll.u32 %s284_s13, 4  ;;  %s1303_s21 = scalar_lea.hbm %s1350_s7, %s764_s18  ;;  %s1298_s16 = int_to_ptr.vmem [resolvable:$true] %s677_s16 }
  0x3b   : > { %884 = vmatpush3.bf16.msra.mxu1 %v883_v7  ;;  %v476_v36 = vld [vmem:[%s1348_s5] sm:$0xff]  ;;  %v901_v41 = vpack.c.bf16 %v479_v40, %v478_v38  ;;  %v578_v56 = vld [vmem:[#allocation2 + $0x10] sm:$0xff]  ;;  %v579_v58 = vld [vmem:[#allocation2 + $0x18] sm:$0xff]  ;;  %s664_s22 = scalar_lea.sflag [#allocation4], %s282_s17  ;;  %s1015_s23 = scalar_lea.vmem %s1298_s16, 128 }
  0x3c   : > { %885 = vmatprep.subr.bf16.mxu1 %v1086_v0  ;;  %v898_v39 = vpack.c.bf16 %v477_v37, %v476_v36  ;;  %v576_v54 = vld [vmem:[#allocation2] sm:$0xff]  ;;  %v907_v59 = vpack.c.bf16 %v579_v58, %v578_v56  ;;  %v581_v61 = vld [vmem:[#allocation2 + $0x28] sm:$0xff]  ;;  %v582_v63 = vld [vmem:[#allocation2 + $0x30] sm:$0xff]  ;;  %p1016_p6 = scmp.ne.s32.totalorder %s1298_s16, %s1015_s23  ;;  %p1361_p9 = scmp.ne.s32.totalorder %s1354_s11, 0 }
  0x3d   : > { %v904_v57 = vpack.c.bf16 %v577_v55, %v576_v54  ;;  %v580_v60 = vld [vmem:[#allocation2 + $0x20] sm:$0xff]  ;;  %v585_v4 = vld [vmem:[#allocation2 + $0x48] sm:$0xff]  ;;  %v586_v6 = vld [vmem:[#allocation2 + $0x50] sm:$0xff]  ;;  %s1090_s28 = smov [#allocation5]  }
  0x3e   : > { %812 = vmatmul.mubr.msk.f32.vlgmr.msra.gmra.mrb[0].mxu1 %vm302_vm1, %v289_v8  ;;  %v910_v62 = vpack.c.bf16 %v581_v61, %v580_v60  ;;  %v584_v3 = vld [vmem:[#allocation2 + $0x40] sm:$0xff]  ;;  %v587_v7 = vld [vmem:[#allocation2 + $0x58] sm:$0xff]  ;;  %v589_v10 = vld [vmem:[#allocation2 + $0x68] sm:$0xff]  ;;  %p1017_p10 = pnand %p1016_p6, %p1361_p9  ;;  %s1019_s29 = sshll.u32 %s1090_s28, 4  ;;  %s1020_s29 = int_to_ptr.vmem [resolvable:$false] %s1019_s29 }
  0x3f   : > { %830 = vmatprep.mubr.msk.f32.mxu1 %vm1087_vm0, %v1088_v1  ;;  %887 = vmatpush3.bf16.msra.mxu1 %v886_v11  ;;  %v916_v5 = vpack.c.bf16 %v585_v4, %v584_v3  ;;  %v919_v8 = vpack.c.bf16 %v587_v7, %v586_v6  ;;  %v588_v9 = vld [vmem:[#allocation2 + $0x60] sm:$0xff]  ;;  %v590_v16 = vld [vmem:[#allocation2 + $0x70] sm:$0xff]  ;;  %s1021_s8 = scalar_lea.vmem %s1020_s29, 256  ;;  %p1022_p2 = scmp.lt.s32.totalorder %s1298_s16, %s1020_s29 }
  0x40   : > { %888 = vmatprep.subr.bf16.mxu1 %v1086_v0  ;;  %905 = vmatpush3.bf16.msra.mxu0 %v904_v57  ;;  %v922_v11 = vpack.c.bf16 %v589_v10, %v588_v9  ;;  %p1018_p12 = pneg %p1017_p10  ;;  %p1023_p3 = scmp.lt.s32.totalorder %s1021_s8, %s1015_s23 }
  0x41   : > { %906 = vmatprep.subr.bf16.mxu0 %v1086_v0 }
  0x42   : > { %p1024_p4 = por %p1023_p3, %p1022_p2 }
  0x43   : > { %890 = vmatpush3.bf16.msra.mxu1 %v889_v14 }
  0x44   : > { %891 = vmatprep.subr.bf16.mxu1 %v1086_v0  ;;  %908 = vmatpush3.bf16.msra.mxu0 %v907_v59  ;;  %p1025_p7 = pnand %p1024_p4, %p1018_p12 }
  0x45   : > { %909 = vmatprep.subr.bf16.mxu0 %v1086_v0 }
  0x47   : > { %893 = vmatpush3.bf16.msra.mxu1 %v892_v17  ;;  %v591_v17 = vld [vmem:[#allocation2 + $0x78] sm:$0xff] }
  0x48   : > { %894 = vmatprep.subr.bf16.mxu1 %v1086_v0  ;;  %911 = vmatpush3.bf16.msra.mxu0 %v910_v62  ;;  %v925_v18 = vpack.c.bf16 %v591_v17, %v590_v16 }
  0x49   : > { %912 = vmatprep.subr.bf16.mxu0 %v1086_v0 }
  0x4b   : > { %896 = vmatpush3.bf16.msra.mxu1 %v895_v20 }
  0x4c   : > { %897 = vmatprep.subr.bf16.mxu1 %v1086_v0 }
 0x111   : > { %v372_v22 = vpop.f32.mrb[0].mxu1 }
 0x112   : > { %v373_v23 = vadd.f32 %v756_v21, %v372_v22  ;;  %v813_v24 = vpop.f32.mrb[1].mxu1 }
 0x114   : > { %v377_v25 = vmul.f32 0.70710677, %v373_v23  ;;  %v376_v27 = vmul.f32 0.5, %v373_v23 }
 0x116   : > { %983 = verf.f32 %v377_v25 }
 0x120   : > { %v984_v26 = vpop.eup %983 }
 0x121   : > { %v379_v28 = vadd.f32 1.0, %v984_v26 }
 0x123   : > { %v380_v29 = vmul.f32 %v379_v28, %v376_v27 }
 0x125   : > { %831 = vmatmul.mubr.msk.f32.vlgmr.msra.gmra.mrb[2].mxu1 %vm395_vm2, %v380_v29 }
 0x126   : > { %841 = vmatprep.mubr.msk.f32.mxu1 %vm1087_vm0, %v1088_v1  ;;  %899 = vmatpush3.bf16.msra.mxu1 %v898_v39  ;;  %v583_v1 = vld [vmem:[#allocation2 + $0x38] sm:$0xff] }
 0x127   : > { %900 = vmatprep.subr.bf16.mxu1 %v1086_v0  ;;  %v913_v2 = vpack.c.bf16 %v583_v1, %v582_v63 }
 0x129   : > { %914 = vmatpush3.bf16.msra.mxu0 %v913_v2 }
 0x12a   : > { %902 = vmatpush3.bf16.msra.mxu1 %v901_v41  ;;  %915 = vmatprep.subr.bf16.mxu0 %v1086_v0 }
 0x12d   : > { %917 = vmatpush3.bf16.msra.mxu0 %v916_v5 }
 0x12e   : > { %918 = vmatprep.subr.bf16.mxu0 %v1086_v0 }
 0x131   : > { %920 = vmatpush3.bf16.msra.mxu0 %v919_v8 }
 0x132   : > { %921 = vmatprep.subr.bf16.mxu0 %v1086_v0 }
 0x135   : > { %923 = vmatpush3.bf16.msra.mxu0 %v922_v11 }
 0x136   : > { %924 = vmatprep.subr.bf16.mxu0 %v1086_v0  ;;  %v1089_v0 = vmov 1.0  }
 0x139   : > { %926 = vmatpush3.bf16.msra.mxu0 %v925_v18 }
 0x1f8   : > { %v465_v31 = vpop.f32.mrb[2].mxu1 }
 0x1f9   : > { %v466_v32 = vadd.f32 %v758_v30, %v465_v31  ;;  %v832_v33 = vpop.f32.mrb[3].mxu1 }
 0x1fb   : > { %v469_v34 = vmul.f32 %v466_v32, %v466_v32 }
 0x1fd   : > { %v470_v35 = vsel %vm302_vm1, %v469_v34, 0.0 }
 0x1fe   : > { %471 = vadd.xlane.f32.xlu0 %v470_v35 }
 0x28b   : > { %v472_v42 = vpop.xlane.xlu0 %471 }
 0x28c   : > { %v473_v43 = vmax.f32 %v472_v42, 1e-24 }
 0x28e   : > { %985 = vrsqrt.f32 %v473_v43 }
 0x298   : > { %v986_v44 = vpop.eup %985 }
 0x299   : > { %v475_v45 = vmul.f32 %v986_v44, %v466_v32 }
 0x29b   : > { %842 = vmatmul.mubr.msk.f32.vlgmr.msra.gmra.mrb[4].mxu1 %vm302_vm1, %v475_v45 }
 0x36e   : > { %v549_v46 = vpop.f32.mrb[4].mxu1 }
 0x36f   : > { %555 = vmax.xlane.f32.xlu0 %v549_v46  ;;  %v843_v47 = vpop.f32.mrb[5].mxu1 }
 0x3fc   : > { %v556_v50 = vpop.xlane.xlu0 %555 }
 0x3fd   : > { %vm557_vm3 = vcmp.eq.f32.partialorder %v549_v46, %v556_v50 }
 0x3fe   : > { %v558_v51 = vsel %vm557_vm3, %v554_v49, 128 }
 0x3ff   : > { %v560_v52 = vshra.s32 %v558_v51, 16  ;;  %v559_v12 = vand.u32 65535, %v558_v51 }
 0x401   : > { %v562_v53 = vcvt.s32.f32 %v560_v52  ;;  %v561_v14 = vcvt.s32.f32 %v559_v12 }
 0x403   : > { %563 = vmin.xlane.f32.xlu1 %v562_v53 }
 0x490   : > { %v564_v13 = vpop.xlane.xlu1 %563 }
 0x491   : > { %vm565_vm4 = vcmp.eq.f32.partialorder %v562_v53, %v564_v13  ;;  %v570_v19 = vcvt.f32.s32 %v564_v13 }
 0x492   : > { %v566_v15 = vsel %vm565_vm4, %v561_v14, inf }
 0x493   : > { %567 = vmin.xlane.f32.xlu1 %v566_v15  ;;  %v571_v21 = vshll.u32 %v570_v19, 16 }
 0x520   : > { %v568_v20 = vpop.xlane.xlu1 %567 }
 0x521   : > { %v569_v22 = vcvt.f32.s32 %v568_v20 }
 0x523   : > { %v572_v23 = vadd.s32 %v571_v21, %v569_v22 }
 0x525   : > { %vm573_vm5 = vcmp.eq.s32.totalorder %v554_v49, %v572_v23 }
 0x526   : > { %877 = vmatmul.mubr.msk.f32.vlgmr.msra.gmra.mrb[0].mxu0 %vm573_vm5, %v1089_v0 }
 0x5f9   : > { %v658_v24 = vpop.f32.mrb[0].mxu0 }
 0x5fa   : > { %662 = vst [vmem:[%s284_s13] sm:$0xff] %v658_v24  ;;  %v878_v25 = vpop.f32.mrb[1].mxu0 }
 0x5fb   : > { %1028 = shalt.err (!%p1025_p7)
}
 0x5fc   : > { %s1029_s9 = scalar_lea.hbm %s1303_s21, 128  ;;  %s1033_s15 = scalar_lea.hbm %s1350_s7, 256 }
 0x5fd   : > { %p1030_p8 = scmp.ne.s32.totalorder %s1303_s21, %s1029_s9  ;;  %p1034_p1 = scmp.lt.u32.totalorder %s1303_s21, %s1350_s7 }
 0x5fe   : > { %p1035_p0 = scmp.lt.u32.totalorder %s1033_s15, %s1029_s9  ;;  %p1037_p6 = scmp.lt.u32.totalorder %s1029_s9, %s1303_s21 }
 0x5ff   : > { %p1031_p11 = pnand %p1030_p8, %p1361_p9 }
 0x600   : > { %p1036_p5 = por %p1035_p0, %p1034_p1 }
 0x601   : > { %p1032_p13 = pneg %p1031_p11 }
 0x602   : > { %p1038_p10 = por %p1037_p6, %p1036_p5 }
 0x604   : > { %p1039_p12 = pnand %p1038_p10, %p1032_p13 }
 0x606   : > { %1042 = shalt.err (!%p1039_p12)
}
 0x607   : > { %931 = dma.vmem_to_hbm [thread:$0]  (%p1361_p9), %s1298_s16, 128, %s1303_s21, %s664_s22  }
 0x608 PF: > { %p943_p2 = scmp.ge.s32.totalorder %s1081_s27, 2  ;;  %s689_s19 = sand.u32 1, %s1069_s24  }
 0x609   : > { %p1362_p3 = scmp.ne.s32.totalorder %s1355_s12, 0  ;;  %s690_s20 = scalar_lea.sflag [#allocation4], %s689_s19 }
 0x60b   : > { %p938_p4 = pnand %p943_p2, %p1362_p3 }
 0x60d   : > { %1064 = dma.done.wait (!%p938_p4), %s690_s20, 128  }
 0x60e   : > { %1066 = vsyncadd (!%p938_p4), %s690_s20, 4294967168  ;;  %p18_p7 = scmp.ge.s32.totalorder %s1156_s30, 4   ;;  %s1363_s24 = smov %s1073_s25 }
 0x60f   : > { %s1364_s25 = smov %s1077_s26  ;;  %s1365_s26 = smov %s1167_s10 }
 0x610   : > { %s1366_s27 = smov %s1156_s30  ;;  %20 = sbr.rel (!%p18_p7) target bundleno = 4 (0x4), region = 88 }
 0x617   :  { %695 = vsyncpa [#allocation3], 1 }
 0x618   :  { %697 = vsyncpa [#allocation3 + $0x1], 1 }
 0x619   :  { %698 = vsyncpa [#allocation4], 1 }
 0x61a   :  { %700 = vsyncpa [#allocation4 + $0x1], 1 }

</bundles_post_ra>
